<compile_context>
chip_gen: v5e
topology: v5e:2x2
jax: 0.10.0
libtpu: 0.0.40
codegen_flags: <defaults>
</compile_context>

<pallas_src>
import jax
import jax.numpy as jnp
from jax import lax
from jax.experimental import pallas as pl
from jax.experimental.pallas import tpu as pltpu

_LANE = 128      # TPU lane width (pad output feature dim to a multiple of this)
_SUBLANE = 8     # TPU sublane tile


def _make_kernel(B, S, nb, H, Rp):
    """Build the fused RNN + Linear kernel for static (B, S, nb, H, Rp)."""
    R = B * S

    def kernel(x_ref, wih_t_ref, whh_t_ref, br_ref, wlin_t_ref, bl_ref, out_ref):
        # x_ref:      (Rp, nb)    batch-major rows (row = b*S + t), natural torch layout
        # wih_t_ref:  (nb, H)     W_ih^T
        # whh_t_ref:  (H, H)      W_hh^T
        # br_ref:     (1, H)      b_ih + b_hh
        # wlin_t_ref: (H, nbp)    W_lin^T zero-padded on the lane (output-feature) dim
        # bl_ref:     (1, nbp)    b_lin zero-padded
        # out_ref:    (Rp, nbp)   lane-dense output slab (only first nb lanes are real)

        # 1) Hoisted input projection + bias for ALL (b, t): one MXU matmul, value-resident.
        pre = (
            jnp.dot(x_ref[...], wih_t_ref[...], preferred_element_type=jnp.float32)
            + br_ref[...]
        )  # (Rp, H)

        # Loop-invariant recurrent weight, hoisted out of the serial loop.
        whh_t = whh_t_ref[...]
        # TODO(synk): drive the MXU weight-stationary across the serial loop
        # (pltpu.matmul_push_rhs / matmul_acc_lhs / matmul_pop) so W_hh^T is pushed once.

        # 2) Serial recurrence, fully vreg-resident. Independent per-batch chains as fully
        #    unrolled Python loops (B, S static); the scheduler interleaves the chains'
        #    MXU pushes and EUP tanh. State is a full (8, H) sublane tile (8 redundant
        #    copies of the chain) so every matmul is a tile-aligned (8, H) @ (H, H).
        # TODO(synk): for long sequences, chunk the unroll (~8 steps/chunk); for padded
        # batch >= 16 add a batch-tile grid with dimension_semantics=("parallel",) (v7x 2 TCs).
        hs_rows = []
        for b in range(B):
            h = jnp.zeros((_SUBLANE, H), dtype=jnp.float32)
            for t in range(S):
                r = b * S + t
                # (1, H) row broadcasts over the 8 redundant state rows.
                h = jnp.tanh(
                    pre[r:r + 1, :]
                    + jnp.dot(h, whh_t, preferred_element_type=jnp.float32)
                )
                hs_rows.append(h[0:1, :])            # one real row per (b, t)
        if Rp != R:
            hs_rows.append(jnp.zeros((Rp - R, H), dtype=jnp.float32))
        hs = jnp.concatenate(hs_rows, axis=0)        # (Rp, H), batch-major

        # 3) Hoisted output Linear into a lane-dense slab: one MXU matmul + bias,
        #    stored with full unmasked vector stores.
        out_ref[...] = (
            jnp.dot(hs, wlin_t_ref[...], preferred_element_type=jnp.float32)
            + bl_ref[...]
        ).astype(out_ref.dtype)

    return kernel


def recurrent_model_forward(x, w_ih, w_hh, b_ih, b_hh, w_lin, b_lin):
    """x: (B, S, nb) batch-first, like the PyTorch module. Returns (B, S, nb)."""
    B, S, nb = x.shape
    H = w_hh.shape[0]
    R = B * S
    Rp = ((R + _SUBLANE - 1) // _SUBLANE) * _SUBLANE
    nbp = ((nb + _LANE - 1) // _LANE) * _LANE        # lane-dense output width

    # Natural (batch-major) layout: contiguous reshape, no transpose copy around the call.
    x2d = x.reshape(R, nb).astype(jnp.float32)
    if Rp != R:
        x2d = jnp.pad(x2d, ((0, Rp - R), (0, 0)))

    wih_t = jnp.transpose(w_ih).astype(jnp.float32)                      # (nb, H)
    whh_t = jnp.transpose(w_hh).astype(jnp.float32)                      # (H, H)
    br = (b_ih + b_hh).reshape(1, H).astype(jnp.float32)                 # (1, H)
    wlin_t = jnp.pad(jnp.transpose(w_lin).astype(jnp.float32),
                     ((0, 0), (0, nbp - nb)))                            # (H, nbp)
    bl = jnp.pad(b_lin.reshape(1, nb).astype(jnp.float32),
                 ((0, 0), (0, nbp - nb)))                                # (1, nbp)

    vmem = pl.BlockSpec(memory_space=pltpu.MemorySpace.VMEM)
    out2d = pl.pallas_call(
        _make_kernel(B, S, nb, H, Rp),
        out_shape=jax.ShapeDtypeStruct((Rp, nbp), jnp.float32),
        in_specs=[vmem] * 6,
        out_specs=vmem,
        compiler_params=pltpu.CompilerParams(vmem_limit_bytes=32 * 1024 * 1024),
    )(x2d, wih_t, whh_t, br, wlin_t, bl)

    # Drop lane padding and restore (B, S, nb); batch-major rows reshape contiguously.
    return out2d[:R, :nb].reshape(B, S, nb)


def reference_forward(x, w_ih, w_hh, b_ih, b_hh, w_lin, b_lin):
    """Pure-JAX reference (mirrors PyTorch nn.RNN + nn.Linear)."""
    B, S, nb = x.shape
    H = w_hh.shape[0]
    h0 = jnp.zeros((B, H), jnp.float32)

    def step(h, x_t):
        h_new = jnp.tanh(x_t @ w_ih.T + b_ih + h @ w_hh.T + b_hh)
        return h_new, h_new

    _, hs = lax.scan(step, h0, jnp.transpose(x, (1, 0, 2)))              # (S, B, H)
    hs = jnp.transpose(hs, (1, 0, 2))                                    # (B, S, H)
    return hs @ w_lin.T + b_lin


def init_params(key, nb, H):
    """Deterministic init matching the module: xavier_uniform RNN weights, zero RNN biases,
    PyTorch-default uniform Linear."""
    k1, k2, k3, k4 = jax.random.split(key, 4)
    bound_ih = jnp.sqrt(6.0 / (H + nb))
    bound_hh = jnp.sqrt(6.0 / (H + H))
    w_ih = jax.random.uniform(k1, (H, nb), jnp.float32, -bound_ih, bound_ih)
    w_hh = jax.random.uniform(k2, (H, H), jnp.float32, -bound_hh, bound_hh)
    b_ih = jnp.zeros((H,), jnp.float32)
    b_hh = jnp.zeros((H,), jnp.float32)
    bound_lin = 1.0 / jnp.sqrt(jnp.float32(H))
    w_lin = jax.random.uniform(k3, (nb, H), jnp.float32, -bound_lin, bound_lin)
    b_lin = jax.random.uniform(k4, (nb,), jnp.float32, -bound_lin, bound_lin)
    return w_ih, w_hh, b_ih, b_hh, w_lin, b_lin


# TODO(synk): GRU / LSTM variants of the module (type != 'RNN') are not implemented here.

if __name__ == "__main__":
    # Small shapes consistent with the module: base b=4, hidden_dim=32, batch=2, seq=8.
    B, S, nb, H = 2, 8, 4, 32

    key = jax.random.PRNGKey(0)
    kx, kp = jax.random.split(key)
    x = jax.random.normal(kx, (B, S, nb), jnp.float32)
    params = init_params(kp, nb, H)

    fwd = jax.jit(recurrent_model_forward)
    out = jax.block_until_ready(fwd(x, *params))

    ref = reference_forward(x, *params)
    assert out.shape == (B, S, nb)
    assert jnp.allclose(out, ref, atol=1e-5, rtol=1e-5), "mismatch vs pure-JAX reference"

    print("KERNEL_OK")
</pallas_src>

<mosaic_0001>
module attributes {stable_mosaic.version = 11 : i64} {
  func.func @kernel(%arg0: memref<16x4xf32, #tpu.memory_space<vmem>>, %arg1: memref<4x32xf32, #tpu.memory_space<vmem>>, %arg2: memref<32x32xf32, #tpu.memory_space<vmem>>, %arg3: memref<1x32xf32, #tpu.memory_space<vmem>>, %arg4: memref<32x128xf32, #tpu.memory_space<vmem>>, %arg5: memref<1x128xf32, #tpu.memory_space<vmem>>, %arg6: memref<16x128xf32, #tpu.memory_space<vmem>>) attributes {dimension_semantics = [], scalar_prefetch = 0 : i64, scratch_operands = 0 : i64, tpu.core_type = #tpu.core_type<tc>} {
    %c0 = arith.constant 0 : index
    %c0_0 = arith.constant 0 : index
    %0 = vector.load %arg0[%c0, %c0_0] : memref<16x4xf32, #tpu.memory_space<vmem>>, vector<16x4xf32>
    %c0_1 = arith.constant 0 : index
    %c0_2 = arith.constant 0 : index
    %1 = vector.load %arg1[%c0_1, %c0_2] : memref<4x32xf32, #tpu.memory_space<vmem>>, vector<4x32xf32>
    %cst = arith.constant dense<0.000000e+00> : vector<16x32xf32>
    %2 = tpu.matmul %0, %1, %cst {dimension_numbers = #tpu.dot_dimension_numbers<[1], [0], [0], [1], [0, 0, 1, 1], [], []>} : vector<16x4xf32>, vector<4x32xf32>, vector<16x32xf32> -> vector<16x32xf32>
    %c0_3 = arith.constant 0 : index
    %c0_4 = arith.constant 0 : index
    %3 = vector.load %arg3[%c0_3, %c0_4] : memref<1x32xf32, #tpu.memory_space<vmem>>, vector<1x32xf32>
    %4 = vector.broadcast %3 : vector<1x32xf32> to vector<16x32xf32>
    %5 = arith.addf %2, %4 : vector<16x32xf32>
    %c0_5 = arith.constant 0 : index
    %c0_6 = arith.constant 0 : index
    %6 = vector.load %arg2[%c0_5, %c0_6] : memref<32x32xf32, #tpu.memory_space<vmem>>, vector<32x32xf32>
    %cst_7 = arith.constant 0.000000e+00 : f32
    %7 = vector.broadcast %cst_7 : f32 to vector<8x32xf32>
    %8 = vector.extract_strided_slice %5 {offsets = [0, 0], sizes = [1, 32], strides = [1, 1]} : vector<16x32xf32> to vector<1x32xf32>
    %cst_8 = arith.constant dense<0.000000e+00> : vector<8x32xf32>
    %9 = tpu.matmul %7, %6, %cst_8 {dimension_numbers = #tpu.dot_dimension_numbers<[1], [0], [0], [1], [0, 0, 1, 1], [], []>} : vector<8x32xf32>, vector<32x32xf32>, vector<8x32xf32> -> vector<8x32xf32>
    %10 = vector.broadcast %8 : vector<1x32xf32> to vector<8x32xf32>
    %11 = arith.addf %10, %9 : vector<8x32xf32>
    %12 = math.tanh %11 : vector<8x32xf32>
    %13 = vector.extract_strided_slice %12 {offsets = [0, 0], sizes = [1, 32], strides = [1, 1]} : vector<8x32xf32> to vector<1x32xf32>
    %14 = vector.extract_strided_slice %5 {offsets = [1, 0], sizes = [1, 32], strides = [1, 1]} : vector<16x32xf32> to vector<1x32xf32>
    %cst_9 = arith.constant dense<0.000000e+00> : vector<8x32xf32>
    %15 = tpu.matmul %12, %6, %cst_9 {dimension_numbers = #tpu.dot_dimension_numbers<[1], [0], [0], [1], [0, 0, 1, 1], [], []>} : vector<8x32xf32>, vector<32x32xf32>, vector<8x32xf32> -> vector<8x32xf32>
    %16 = vector.broadcast %14 : vector<1x32xf32> to vector<8x32xf32>
    %17 = arith.addf %16, %15 : vector<8x32xf32>
    %18 = math.tanh %17 : vector<8x32xf32>
    %19 = vector.extract_strided_slice %18 {offsets = [0, 0], sizes = [1, 32], strides = [1, 1]} : vector<8x32xf32> to vector<1x32xf32>
    %20 = vector.extract_strided_slice %5 {offsets = [2, 0], sizes = [1, 32], strides = [1, 1]} : vector<16x32xf32> to vector<1x32xf32>
    %cst_10 = arith.constant dense<0.000000e+00> : vector<8x32xf32>
    %21 = tpu.matmul %18, %6, %cst_10 {dimension_numbers = #tpu.dot_dimension_numbers<[1], [0], [0], [1], [0, 0, 1, 1], [], []>} : vector<8x32xf32>, vector<32x32xf32>, vector<8x32xf32> -> vector<8x32xf32>
    %22 = vector.broadcast %20 : vector<1x32xf32> to vector<8x32xf32>
    %23 = arith.addf %22, %21 : vector<8x32xf32>
    %24 = math.tanh %23 : vector<8x32xf32>
    %25 = vector.extract_strided_slice %24 {offsets = [0, 0], sizes = [1, 32], strides = [1, 1]} : vector<8x32xf32> to vector<1x32xf32>
    %26 = vector.extract_strided_slice %5 {offsets = [3, 0], sizes = [1, 32], strides = [1, 1]} : vector<16x32xf32> to vector<1x32xf32>
    %cst_11 = arith.constant dense<0.000000e+00> : vector<8x32xf32>
    %27 = tpu.matmul %24, %6, %cst_11 {dimension_numbers = #tpu.dot_dimension_numbers<[1], [0], [0], [1], [0, 0, 1, 1], [], []>} : vector<8x32xf32>, vector<32x32xf32>, vector<8x32xf32> -> vector<8x32xf32>
    %28 = vector.broadcast %26 : vector<1x32xf32> to vector<8x32xf32>
    %29 = arith.addf %28, %27 : vector<8x32xf32>
    %30 = math.tanh %29 : vector<8x32xf32>
    %31 = vector.extract_strided_slice %30 {offsets = [0, 0], sizes = [1, 32], strides = [1, 1]} : vector<8x32xf32> to vector<1x32xf32>
    %32 = vector.extract_strided_slice %5 {offsets = [4, 0], sizes = [1, 32], strides = [1, 1]} : vector<16x32xf32> to vector<1x32xf32>
    %cst_12 = arith.constant dense<0.000000e+00> : vector<8x32xf32>
    %33 = tpu.matmul %30, %6, %cst_12 {dimension_numbers = #tpu.dot_dimension_numbers<[1], [0], [0], [1], [0, 0, 1, 1], [], []>} : vector<8x32xf32>, vector<32x32xf32>, vector<8x32xf32> -> vector<8x32xf32>
    %34 = vector.broadcast %32 : vector<1x32xf32> to vector<8x32xf32>
    %35 = arith.addf %34, %33 : vector<8x32xf32>
    %36 = math.tanh %35 : vector<8x32xf32>
    %37 = vector.extract_strided_slice %36 {offsets = [0, 0], sizes = [1, 32], strides = [1, 1]} : vector<8x32xf32> to vector<1x32xf32>
    %38 = vector.extract_strided_slice %5 {offsets = [5, 0], sizes = [1, 32], strides = [1, 1]} : vector<16x32xf32> to vector<1x32xf32>
    %cst_13 = arith.constant dense<0.000000e+00> : vector<8x32xf32>
    %39 = tpu.matmul %36, %6, %cst_13 {dimension_numbers = #tpu.dot_dimension_numbers<[1], [0], [0], [1], [0, 0, 1, 1], [], []>} : vector<8x32xf32>, vector<32x32xf32>, vector<8x32xf32> -> vector<8x32xf32>
    %40 = vector.broadcast %38 : vector<1x32xf32> to vector<8x32xf32>
    %41 = arith.addf %40, %39 : vector<8x32xf32>
    %42 = math.tanh %41 : vector<8x32xf32>
    %43 = vector.extract_strided_slice %42 {offsets = [0, 0], sizes = [1, 32], strides = [1, 1]} : vector<8x32xf32> to vector<1x32xf32>
    %44 = vector.extract_strided_slice %5 {offsets = [6, 0], sizes = [1, 32], strides = [1, 1]} : vector<16x32xf32> to vector<1x32xf32>
    %cst_14 = arith.constant dense<0.000000e+00> : vector<8x32xf32>
    %45 = tpu.matmul %42, %6, %cst_14 {dimension_numbers = #tpu.dot_dimension_numbers<[1], [0], [0], [1], [0, 0, 1, 1], [], []>} : vector<8x32xf32>, vector<32x32xf32>, vector<8x32xf32> -> vector<8x32xf32>
    %46 = vector.broadcast %44 : vector<1x32xf32> to vector<8x32xf32>
    %47 = arith.addf %46, %45 : vector<8x32xf32>
    %48 = math.tanh %47 : vector<8x32xf32>
    %49 = vector.extract_strided_slice %48 {offsets = [0, 0], sizes = [1, 32], strides = [1, 1]} : vector<8x32xf32> to vector<1x32xf32>
    %50 = vector.extract_strided_slice %5 {offsets = [7, 0], sizes = [1, 32], strides = [1, 1]} : vector<16x32xf32> to vector<1x32xf32>
    %cst_15 = arith.constant dense<0.000000e+00> : vector<8x32xf32>
    %51 = tpu.matmul %48, %6, %cst_15 {dimension_numbers = #tpu.dot_dimension_numbers<[1], [0], [0], [1], [0, 0, 1, 1], [], []>} : vector<8x32xf32>, vector<32x32xf32>, vector<8x32xf32> -> vector<8x32xf32>
    %52 = vector.broadcast %50 : vector<1x32xf32> to vector<8x32xf32>
    %53 = arith.addf %52, %51 : vector<8x32xf32>
    %54 = math.tanh %53 : vector<8x32xf32>
    %55 = vector.extract_strided_slice %54 {offsets = [0, 0], sizes = [1, 32], strides = [1, 1]} : vector<8x32xf32> to vector<1x32xf32>
    %cst_16 = arith.constant 0.000000e+00 : f32
    %56 = vector.broadcast %cst_16 : f32 to vector<8x32xf32>
    %57 = vector.extract_strided_slice %5 {offsets = [8, 0], sizes = [1, 32], strides = [1, 1]} : vector<16x32xf32> to vector<1x32xf32>
    %cst_17 = arith.constant dense<0.000000e+00> : vector<8x32xf32>
    %58 = tpu.matmul %56, %6, %cst_17 {dimension_numbers = #tpu.dot_dimension_numbers<[1], [0], [0], [1], [0, 0, 1, 1], [], []>} : vector<8x32xf32>, vector<32x32xf32>, vector<8x32xf32> -> vector<8x32xf32>
    %59 = vector.broadcast %57 : vector<1x32xf32> to vector<8x32xf32>
    %60 = arith.addf %59, %58 : vector<8x32xf32>
    %61 = math.tanh %60 : vector<8x32xf32>
    %62 = vector.extract_strided_slice %61 {offsets = [0, 0], sizes = [1, 32], strides = [1, 1]} : vector<8x32xf32> to vector<1x32xf32>
    %63 = vector.extract_strided_slice %5 {offsets = [9, 0], sizes = [1, 32], strides = [1, 1]} : vector<16x32xf32> to vector<1x32xf32>
    %cst_18 = arith.constant dense<0.000000e+00> : vector<8x32xf32>
    %64 = tpu.matmul %61, %6, %cst_18 {dimension_numbers = #tpu.dot_dimension_numbers<[1], [0], [0], [1], [0, 0, 1, 1], [], []>} : vector<8x32xf32>, vector<32x32xf32>, vector<8x32xf32> -> vector<8x32xf32>
    %65 = vector.broadcast %63 : vector<1x32xf32> to vector<8x32xf32>
    %66 = arith.addf %65, %64 : vector<8x32xf32>
    %67 = math.tanh %66 : vector<8x32xf32>
    %68 = vector.extract_strided_slice %67 {offsets = [0, 0], sizes = [1, 32], strides = [1, 1]} : vector<8x32xf32> to vector<1x32xf32>
    %69 = vector.extract_strided_slice %5 {offsets = [10, 0], sizes = [1, 32], strides = [1, 1]} : vector<16x32xf32> to vector<1x32xf32>
    %cst_19 = arith.constant dense<0.000000e+00> : vector<8x32xf32>
    %70 = tpu.matmul %67, %6, %cst_19 {dimension_numbers = #tpu.dot_dimension_numbers<[1], [0], [0], [1], [0, 0, 1, 1], [], []>} : vector<8x32xf32>, vector<32x32xf32>, vector<8x32xf32> -> vector<8x32xf32>
    %71 = vector.broadcast %69 : vector<1x32xf32> to vector<8x32xf32>
    %72 = arith.addf %71, %70 : vector<8x32xf32>
    %73 = math.tanh %72 : vector<8x32xf32>
    %74 = vector.extract_strided_slice %73 {offsets = [0, 0], sizes = [1, 32], strides = [1, 1]} : vector<8x32xf32> to vector<1x32xf32>
    %75 = vector.extract_strided_slice %5 {offsets = [11, 0], sizes = [1, 32], strides = [1, 1]} : vector<16x32xf32> to vector<1x32xf32>
    %cst_20 = arith.constant dense<0.000000e+00> : vector<8x32xf32>
    %76 = tpu.matmul %73, %6, %cst_20 {dimension_numbers = #tpu.dot_dimension_numbers<[1], [0], [0], [1], [0, 0, 1, 1], [], []>} : vector<8x32xf32>, vector<32x32xf32>, vector<8x32xf32> -> vector<8x32xf32>
    %77 = vector.broadcast %75 : vector<1x32xf32> to vector<8x32xf32>
    %78 = arith.addf %77, %76 : vector<8x32xf32>
    %79 = math.tanh %78 : vector<8x32xf32>
    %80 = vector.extract_strided_slice %79 {offsets = [0, 0], sizes = [1, 32], strides = [1, 1]} : vector<8x32xf32> to vector<1x32xf32>
    %81 = vector.extract_strided_slice %5 {offsets = [12, 0], sizes = [1, 32], strides = [1, 1]} : vector<16x32xf32> to vector<1x32xf32>
    %cst_21 = arith.constant dense<0.000000e+00> : vector<8x32xf32>
    %82 = tpu.matmul %79, %6, %cst_21 {dimension_numbers = #tpu.dot_dimension_numbers<[1], [0], [0], [1], [0, 0, 1, 1], [], []>} : vector<8x32xf32>, vector<32x32xf32>, vector<8x32xf32> -> vector<8x32xf32>
    %83 = vector.broadcast %81 : vector<1x32xf32> to vector<8x32xf32>
    %84 = arith.addf %83, %82 : vector<8x32xf32>
    %85 = math.tanh %84 : vector<8x32xf32>
    %86 = vector.extract_strided_slice %85 {offsets = [0, 0], sizes = [1, 32], strides = [1, 1]} : vector<8x32xf32> to vector<1x32xf32>
    %87 = vector.extract_strided_slice %5 {offsets = [13, 0], sizes = [1, 32], strides = [1, 1]} : vector<16x32xf32> to vector<1x32xf32>
    %cst_22 = arith.constant dense<0.000000e+00> : vector<8x32xf32>
    %88 = tpu.matmul %85, %6, %cst_22 {dimension_numbers = #tpu.dot_dimension_numbers<[1], [0], [0], [1], [0, 0, 1, 1], [], []>} : vector<8x32xf32>, vector<32x32xf32>, vector<8x32xf32> -> vector<8x32xf32>
    %89 = vector.broadcast %87 : vector<1x32xf32> to vector<8x32xf32>
    %90 = arith.addf %89, %88 : vector<8x32xf32>
    %91 = math.tanh %90 : vector<8x32xf32>
    %92 = vector.extract_strided_slice %91 {offsets = [0, 0], sizes = [1, 32], strides = [1, 1]} : vector<8x32xf32> to vector<1x32xf32>
    %93 = vector.extract_strided_slice %5 {offsets = [14, 0], sizes = [1, 32], strides = [1, 1]} : vector<16x32xf32> to vector<1x32xf32>
    %cst_23 = arith.constant dense<0.000000e+00> : vector<8x32xf32>
    %94 = tpu.matmul %91, %6, %cst_23 {dimension_numbers = #tpu.dot_dimension_numbers<[1], [0], [0], [1], [0, 0, 1, 1], [], []>} : vector<8x32xf32>, vector<32x32xf32>, vector<8x32xf32> -> vector<8x32xf32>
    %95 = vector.broadcast %93 : vector<1x32xf32> to vector<8x32xf32>
    %96 = arith.addf %95, %94 : vector<8x32xf32>
    %97 = math.tanh %96 : vector<8x32xf32>
    %98 = vector.extract_strided_slice %97 {offsets = [0, 0], sizes = [1, 32], strides = [1, 1]} : vector<8x32xf32> to vector<1x32xf32>
    %99 = vector.extract_strided_slice %5 {offsets = [15, 0], sizes = [1, 32], strides = [1, 1]} : vector<16x32xf32> to vector<1x32xf32>
    %cst_24 = arith.constant dense<0.000000e+00> : vector<8x32xf32>
    %100 = tpu.matmul %97, %6, %cst_24 {dimension_numbers = #tpu.dot_dimension_numbers<[1], [0], [0], [1], [0, 0, 1, 1], [], []>} : vector<8x32xf32>, vector<32x32xf32>, vector<8x32xf32> -> vector<8x32xf32>
    %101 = vector.broadcast %99 : vector<1x32xf32> to vector<8x32xf32>
    %102 = arith.addf %101, %100 : vector<8x32xf32>
    %103 = math.tanh %102 : vector<8x32xf32>
    %104 = vector.extract_strided_slice %103 {offsets = [0, 0], sizes = [1, 32], strides = [1, 1]} : vector<8x32xf32> to vector<1x32xf32>
    %105 = tpu.concatenate %13, %19, %25, %31, %37, %43, %49, %55, %62, %68, %74, %80, %86, %92, %98, %104 in 0 : vector<1x32xf32>, vector<1x32xf32>, vector<1x32xf32>, vector<1x32xf32>, vector<1x32xf32>, vector<1x32xf32>, vector<1x32xf32>, vector<1x32xf32>, vector<1x32xf32>, vector<1x32xf32>, vector<1x32xf32>, vector<1x32xf32>, vector<1x32xf32>, vector<1x32xf32>, vector<1x32xf32>, vector<1x32xf32> -> vector<16x32xf32>
    %c0_25 = arith.constant 0 : index
    %c0_26 = arith.constant 0 : index
    %106 = vector.load %arg4[%c0_25, %c0_26] : memref<32x128xf32, #tpu.memory_space<vmem>>, vector<32x128xf32>
    %cst_27 = arith.constant dense<0.000000e+00> : vector<16x128xf32>
    %107 = tpu.matmul %105, %106, %cst_27 {dimension_numbers = #tpu.dot_dimension_numbers<[1], [0], [0], [1], [0, 0, 1, 1], [], []>} : vector<16x32xf32>, vector<32x128xf32>, vector<16x128xf32> -> vector<16x128xf32>
    %c0_28 = arith.constant 0 : index
    %c0_29 = arith.constant 0 : index
    %108 = vector.load %arg5[%c0_28, %c0_29] : memref<1x128xf32, #tpu.memory_space<vmem>>, vector<1x128xf32>
    %109 = vector.broadcast %108 : vector<1x128xf32> to vector<16x128xf32>
    %110 = arith.addf %107, %109 : vector<16x128xf32>
    %c0_30 = arith.constant 0 : index
    %c0_31 = arith.constant 0 : index
    %111 = vector.load %arg6[%c0_30, %c0_31] : memref<16x128xf32, #tpu.memory_space<vmem>>, vector<16x128xf32>
    tpu.vector_store %arg6[%c0_30, %c0_31], %110 {strides = array<i32>} : memref<16x128xf32, #tpu.memory_space<vmem>>, vector<16x128xf32>,
    return
  }
}

</mosaic_0001>

<bundles_post_ra>
// kernel: recurrent_model_forward.1
= control target key start
LH: loop header
LB: loop body
LE: loop exit
PB: predicated region body
PF: predicated region fallthrough
CT: control target
= control target key end

     0   :  { %vm37_vm0 = vcmask 1043456   ;;  %vm30_vm1 = vcmask 31744   ;;  %v609_v7 = vmov 0.0   ;;  %vm68_vm2 = vcmask 261120   ;;  %s811_s1 = inlined_call_operand.vmem [shape: f32[4,32], index: 1, kind: input, shape index: {}]   ;;  %s812_s2 = inlined_call_operand.vmem [shape: f32[32,32], index: 2, kind: input, shape index: {}]   ;;  %s813_s0 = inlined_call_operand.vmem [shape: f32[16,4], index: 0, kind: input, shape index: {}]   ;;  %s814_s3 = inlined_call_operand.vmem [shape: f32[1,32], index: 3, kind: input, shape index: {}]   ;;  %s815_s5 = inlined_call_operand.vmem [shape: f32[1,128], index: 5, kind: input, shape index: {}]   ;;  %s816_s4 = inlined_call_operand.vmem [shape: f32[32,128], index: 4, kind: input, shape index: {}]   ;;  %s817_s6 = inlined_call_operand.vmem [shape: f32[16,128], index: 6, kind: output, shape index: {}]  }
   0x1   :  { %v25_v0 = vld [vmem:[%s811_s1] sm:$0xf]  ;;  %v651_v1 = vld [vmem:[%s812_s2 + $0x18] sm:$0xff]  ;;  %v661_v3 = vld [vmem:[%s812_s2 + $0x10] sm:$0xff]  ;;  %vm492_vm3 = vcmask 1040384   ;;  %vm494_vm4 = vcmask 1041408  }
   0x2   :  { %v23_v2 = vld [vmem:[%s813_s0] sm:$0xff]  ;;  %555 = vmatpush.msk.msra.mxu0 %vm37_vm0, %v25_v0  ;;  %84 = vmatpush.msra.mxu2 %v651_v1  ;;  %v667_v4 = vld [vmem:[%s812_s2 + $0x8] sm:$0xff]  ;;  %vm496_vm5 = vcmask 1042432   ;;  %vm499_vm6 = vcmask 1044480   ;;  %vm501_vm7 = vcmask 1045504   ;;  %vm503_vm8 = vcmask 1046528  }
   0x3   :  { %556 = vmatmul.msk.f32.vlgmr.msra.gmra.mxu0 %vm30_vm1, %v23_v2  ;;  %136 = vmatpush.msra.mxu3 %v651_v1  ;;  %v675_v5 = vld [vmem:[%s812_s2] sm:$0xff]  ;;  %v24_v6 = vld [vmem:[%s813_s0 + $0x8] sm:$0xff] }
   0x4   :  { %85 = vmatpush.msra.mxu2 %v661_v3  ;;  %162 = vmatpush.msra.mxu1 %v651_v1  ;;  %v575_v8 = vld [vmem:[%s814_s3] ss:$0 sm:$0xff] }
   0x5   :  { %137 = vmatpush.msra.mxu3 %v661_v3  ;;  %240 = vmatpush.msrb.mxu0 %v651_v1 }
   0x6   :  { %86 = vmatpush.msra.mxu2 %v667_v4  ;;  %163 = vmatpush.msra.mxu1 %v661_v3 }
   0x7   :  { %138 = vmatpush.msra.mxu3 %v667_v4  ;;  %241 = vmatpush.msrb.mxu0 %v661_v3 }
   0x8   :  { %87 = vmatpush.msra.mxu2 %v675_v5  ;;  %164 = vmatpush.msra.mxu1 %v667_v4 }
   0x9   :  { %88 = vmatmul.f32.vlgmr.msra.gmra.mxu2 %v609_v7  ;;  %139 = vmatpush.msra.mxu3 %v675_v5 }
   0xa   :  { %110 = vmatpush.msrb.mxu2 %v651_v1  ;;  %165 = vmatpush.msra.mxu1 %v675_v5 }
   0xb   :  { %557 = vmatmul.msk.f32.gmra.mxu0 %vm30_vm1, %v24_v6  ;;  %214 = vmatpush.msrb.mxu3 %v651_v1 }
   0xc   :  { %111 = vmatpush.msrb.mxu2 %v661_v3  ;;  %242 = vmatpush.msrb.mxu0 %v667_v4 }
   0xd   :  { %215 = vmatpush.msrb.mxu3 %v661_v3  ;;  %266 = vmatpush.msrb.mxu1 %v651_v1 }
   0xe   :  { %112 = vmatpush.msrb.mxu2 %v667_v4  ;;  %243 = vmatpush.msrb.mxu0 %v675_v5 }
   0xf   :  { %216 = vmatpush.msrb.mxu3 %v667_v4  ;;  %267 = vmatpush.msrb.mxu1 %v661_v3 }
  0x10   :  { %347 = vmatpush.msra.mxu0 %v651_v1  ;;  %113 = vmatpush.msrb.mxu2 %v675_v5 }
  0x11   :  { %217 = vmatpush.msrb.mxu3 %v675_v5  ;;  %268 = vmatpush.msrb.mxu1 %v667_v4 }
  0x12   :  { %188 = vmatpush.msra.mxu2 %v651_v1  ;;  %348 = vmatpush.msra.mxu0 %v661_v3 }
  0x13   :  { %269 = vmatpush.msrb.mxu1 %v675_v5 }
  0x14   :  { %189 = vmatpush.msra.mxu2 %v661_v3  ;;  %349 = vmatpush.msra.mxu0 %v667_v4 }
  0x16   :  { %190 = vmatpush.msra.mxu2 %v667_v4  ;;  %350 = vmatpush.msra.mxu0 %v675_v5 }
  0x18   :  { %191 = vmatpush.msra.mxu2 %v675_v5 }
  0x80   :  { %v58_v9 = vpop.f32.mrf.mxu0 }
  0x81   :  { %v716_v10 = vadd.f32 %v575_v8, %v58_v9 }
  0x83   :  { %v92_v11 = vperm.slane %v716_v10, 0  ;;  %v118_v15 = vperm.slane %v716_v10, 1  ;;  %v144_v19 = vperm.slane %v716_v10, 2  ;;  %v170_v29 = vperm.slane %v716_v10, 3 }
  0x84   :  { %v196_v38 = vperm.slane %v716_v10, 4  ;;  %v222_v48 = vperm.slane %v716_v10, 5  ;;  %v248_v62 = vperm.slane %v716_v10, 6 }
  0x88   :  { %v61_v27 = vpop.f32.mrf.mxu0 }
  0x89   :  { %v738_v28 = vadd.f32 %v575_v8, %v61_v27 }
  0x8b   :  { %v277_v32 = vperm.slane %v738_v28, 0  ;;  %v303_v41 = vperm.slane %v738_v28, 1  ;;  %v329_v51 = vperm.slane %v738_v28, 2 }
  0x8c   :  { %v89_v12 = vpop.f32.mrf.mxu2 }
  0x8d   :  { %v93_v13 = vadd.f32 %v92_v11, %v89_v12  ;;  %v278_v33 = vadd.f32 %v277_v32, %v89_v12  ;;  %v515_v11 = vld [vmem:[%s816_s4 + $0x18] sm:$0xff]  ;;  %v514_v12 = vld [vmem:[%s816_s4 + $0x10] sm:$0xff] }
  0x8f   :  { %577 = vtanh.f32 %v93_v13  ;;  %v513_v13 = vld [vmem:[%s816_s4 + $0x8] sm:$0xff] }
  0x95   :  { %v578_v14 = vpop.eup %577 }
  0x96   :  { %558 = vmatmul.msk.f32.vlgmr.msrb.gmra.mxu2 %vm68_vm2, %v578_v14 }
  0x97   :  { %295 = vmatpush.msrb.mxu2 %v651_v1 }
  0x99   :  { %296 = vmatpush.msrb.mxu2 %v661_v3 }
  0x9b   :  { %297 = vmatpush.msrb.mxu2 %v667_v4 }
  0x9d   :  { %298 = vmatpush.msrb.mxu2 %v675_v5 }
 0x119   :  { %v115_v16 = vpop.f32.mrf.mxu2 }
 0x11a   :  { %v119_v17 = vadd.f32 %v118_v15, %v115_v16  ;;  %v274_v15 = vperm.slane %v716_v10, 7 }
 0x11c   :  { %579 = vtanh.f32 %v119_v17 }
 0x122   :  { %v580_v18 = vpop.eup %579 }
 0x123   :  { %559 = vmatmul.msk.f32.vlgmr.msra.gmra.mxu3 %vm68_vm2, %v580_v18  ;;  %v462_v22 = vrot.slane %v580_v18, 7  ;;  %v381_v18 = vperm.slane %v738_v28, 4 }
 0x124   :  { %321 = vmatpush.msra.mxu3 %v651_v1 }
 0x125   :  { %v493_v25 = vsel %vm492_vm3, %v578_v14, %v462_v22  ;;  %v512_v14 = vld [vmem:[%s816_s4] sm:$0xff] }
 0x126   :  { %322 = vmatpush.msra.mxu3 %v661_v3 }
 0x128   :  { %323 = vmatpush.msra.mxu3 %v667_v4 }
 0x12a   :  { %324 = vmatpush.msra.mxu3 %v675_v5 }
 0x1a6   :  { %v141_v20 = vpop.f32.mrf.mxu3 }
 0x1a7   :  { %v145_v21 = vadd.f32 %v144_v19, %v141_v20 }
 0x1a9   :  { %581 = vtanh.f32 %v145_v21 }
 0x1af   :  { %v582_v23 = vpop.eup %581 }
 0x1b0   :  { %v464_v24 = vrot.slane %v582_v23, 6  ;;  %560 = vmatmul.msk.f32.vlgmr.msra.gmra.mxu1 %vm68_vm2, %v582_v23 }
 0x1b1   :  { %373 = vmatpush.msra.mxu1 %v651_v1 }
 0x1b2   :  { %v495_v26 = vsel %vm494_vm4, %v493_v25, %v464_v24 }
 0x1b3   :  { %374 = vmatpush.msra.mxu1 %v661_v3 }
 0x1b5   :  { %375 = vmatpush.msra.mxu1 %v667_v4 }
 0x1b7   :  { %376 = vmatpush.msra.mxu1 %v675_v5 }
 0x22d   :  { %v167_v30 = vpop.f32.mrf.mxu1 }
 0x22e   :  { %v171_v31 = vadd.f32 %v170_v29, %v167_v30  ;;  %v407_v30 = vperm.slane %v738_v28, 5 }
 0x230   :  { %583 = vtanh.f32 %v171_v31 }
 0x231   :  { %585 = vtanh.f32 %v278_v33 }
 0x236   :  { %v584_v34 = vpop.eup %583 }
 0x237   :  { %v466_v35 = vrot.slane %v584_v34, 5  ;;  %561 = vmatmul.msk.f32.vlgmr.msra.gmra.mxu2 %vm68_vm2, %v584_v34  ;;  %v586_v37 = vpop.eup %585 }
 0x238   :  { %399 = vmatpush.msra.mxu2 %v651_v1 }
 0x239   :  { %v497_v36 = vsel %vm496_vm5, %v495_v26, %v466_v35  ;;  %v576_v26 = vld [vmem:[%s815_s5] ss:$0 sm:$0xff] }
 0x23a   :  { %400 = vmatpush.msra.mxu2 %v661_v3 }
 0x23c   :  { %401 = vmatpush.msra.mxu2 %v667_v4 }
 0x23e   :  { %402 = vmatpush.msra.mxu2 %v675_v5 }
 0x23f   :  { %565 = vmatmul.msk.f32.vlgmr.msrb.gmra.mxu2 %vm68_vm2, %v586_v37 }
 0x2ba   :  { %v193_v39 = vpop.f32.mrf.mxu2 }
 0x2bb   :  { %v197_v40 = vadd.f32 %v196_v38, %v193_v39 }
 0x2bd   :  { %587 = vtanh.f32 %v197_v40 }
 0x2c2   :  { %v300_v42 = vpop.f32.mrf.mxu2 }
 0x2c3   :  { %v588_v43 = vpop.eup %587  ;;  %v304_v44 = vadd.f32 %v303_v41, %v300_v42  ;;  %v459_v42 = vperm.slane %v738_v28, 7 }
 0x2c4   :  { %v468_v45 = vrot.slane %v588_v43, 4  ;;  %562 = vmatmul.msk.f32.vlgmr.msrb.gmra.mxu3 %vm68_vm2, %v588_v43 }
 0x2c5   :  { %589 = vtanh.f32 %v304_v44  ;;  %425 = vmatpush.msrb.mxu3 %v651_v1 }
 0x2c6   :  { %v498_v46 = vsel %vm37_vm0, %v497_v36, %v468_v45  ;;  %v433_v36 = vperm.slane %v738_v28, 6 }
 0x2c7   :  { %426 = vmatpush.msrb.mxu3 %v661_v3 }
 0x2c9   :  { %427 = vmatpush.msrb.mxu3 %v667_v4 }
 0x2cb   :  { %v590_v47 = vpop.eup %589  ;;  %428 = vmatpush.msrb.mxu3 %v675_v5 }
 0x2cc   :  { %566 = vmatmul.msk.f32.vlgmr.msra.gmra.mxu3 %vm68_vm2, %v590_v47  ;;  %v477_v57 = vrot.slane %v590_v47, 7 }
 0x2ce   :  { %v505_v60 = vsel %vm492_vm3, %v586_v37, %v477_v57 }
 0x347   :  { %v219_v49 = vpop.f32.mrf.mxu3 }
 0x348   :  { %v223_v50 = vadd.f32 %v222_v48, %v219_v49 }
 0x34a   :  { %591 = vtanh.f32 %v223_v50 }
 0x34f   :  { %v326_v52 = vpop.f32.mrf.mxu3 }
 0x350   :  { %v592_v53 = vpop.eup %591  ;;  %v330_v54 = vadd.f32 %v329_v51, %v326_v52 }
 0x351   :  { %v470_v55 = vrot.slane %v592_v53, 3  ;;  %563 = vmatmul.msk.f32.vlgmr.msrb.gmra.mxu0 %vm68_vm2, %v592_v53 }
 0x352   :  { %593 = vtanh.f32 %v330_v54  ;;  %451 = vmatpush.msrb.mxu0 %v651_v1  ;;  %v355_v1 = vperm.slane %v738_v28, 3 }
 0x353   :  { %v500_v56 = vsel %vm499_vm6, %v498_v46, %v470_v55 }
 0x354   :  { %452 = vmatpush.msrb.mxu0 %v661_v3 }
 0x356   :  { %453 = vmatpush.msrb.mxu0 %v667_v4 }
 0x358   :  { %v594_v58 = vpop.eup %593  ;;  %454 = vmatpush.msrb.mxu0 %v675_v5 }
 0x359   :  { %v479_v59 = vrot.slane %v594_v58, 6  ;;  %567 = vmatmul.msk.f32.vlgmr.msra.gmra.mxu0 %vm68_vm2, %v594_v58 }
 0x35b   :  { %v506_v61 = vsel %vm494_vm4, %v505_v60, %v479_v59 }
 0x3ce   :  { %v245_v63 = vpop.f32.mrf.mxu0 }
 0x3cf   :  { %v249_v0 = vadd.f32 %v248_v62, %v245_v63 }
 0x3d1   :  { %595 = vtanh.f32 %v249_v0 }
 0x3d6   :  { %v352_v2 = vpop.f32.mrf.mxu0 }
 0x3d7   :  { %v596_v3 = vpop.eup %595  ;;  %v356_v4 = vadd.f32 %v355_v1, %v352_v2 }
 0x3d8   :  { %v472_v6 = vrot.slane %v596_v3, 2  ;;  %564 = vmatmul.msk.f32.vlgmr.msrb.gmra.mxu1 %vm68_vm2, %v596_v3 }
 0x3d9   :  { %597 = vtanh.f32 %v356_v4  ;;  %538 = vmatpush.msrb.mxu1 %v515_v11 }
 0x3da   :  { %v502_v5 = vsel %vm501_vm7, %v500_v56, %v472_v6 }
 0x3db   :  { %539 = vmatpush.msrb.mxu1 %v514_v12 }
 0x3dd   :  { %540 = vmatpush.msrb.mxu1 %v513_v13 }
 0x3df   :  { %v598_v7 = vpop.eup %597  ;;  %541 = vmatpush.msrb.mxu1 %v512_v14 }
 0x3e0   :  { %v481_v8 = vrot.slane %v598_v7, 5  ;;  %568 = vmatmul.msk.f32.vlgmr.msra.gmra.mxu1 %vm68_vm2, %v598_v7 }
 0x3e2   :  { %v507_v9 = vsel %vm496_vm5, %v506_v61, %v481_v8 }
 0x455   :  { %v271_v16 = vpop.f32.mrf.mxu1 }
 0x456   :  { %v275_v17 = vadd.f32 %v274_v15, %v271_v16 }
 0x458   :  { %599 = vtanh.f32 %v275_v17 }
 0x45d   :  { %v378_v19 = vpop.f32.mrf.mxu1 }
 0x45e   :  { %v600_v20 = vpop.eup %599  ;;  %v382_v21 = vadd.f32 %v381_v18, %v378_v19 }
 0x45f   :  { %v475_v22 = vrot.slane %v600_v20, 1 }
 0x460   :  { %601 = vtanh.f32 %v382_v21 }
 0x461   :  { %v504_v23 = vsel %vm503_vm8, %v502_v5, %v475_v22 }
 0x462   :  { %572 = vmatmul.msk.f32.vlgmr.msrb.gmra.mxu1 %vm68_vm2, %v504_v23 }
 0x466   :  { %v602_v24 = vpop.eup %601 }
 0x467   :  { %v483_v25 = vrot.slane %v602_v24, 4  ;;  %569 = vmatmul.msk.f32.vlgmr.msra.gmra.mxu2 %vm68_vm2, %v602_v24 }
 0x469   :  { %v508_v10 = vsel %vm37_vm0, %v507_v9, %v483_v25 }
 0x4df   :  { %v543_v27 = vpop.f32.mrf.mxu1 }
 0x4e0   :  { %v544_v29 = vadd.f32 %v576_v26, %v543_v27 }
 0x4e2   :  { %549 = vst [vmem:[%s817_s6] sm:$0xff] %v544_v29 }
 0x4ea   :  { %v404_v31 = vpop.f32.mrf.mxu2 }
 0x4eb   :  { %v408_v32 = vadd.f32 %v407_v30, %v404_v31 }
 0x4ed   :  { %603 = vtanh.f32 %v408_v32 }
 0x4f3   :  { %v604_v33 = vpop.eup %603 }
 0x4f4   :  { %v485_v34 = vrot.slane %v604_v33, 3  ;;  %570 = vmatmul.msk.f32.vlgmr.msrb.gmra.mxu3 %vm68_vm2, %v604_v33 }
 0x4f6   :  { %v509_v35 = vsel %vm499_vm6, %v508_v10, %v485_v34 }
 0x577   :  { %v430_v37 = vpop.f32.mrf.mxu3 }
 0x578   :  { %v434_v38 = vadd.f32 %v433_v36, %v430_v37 }
 0x57a   :  { %605 = vtanh.f32 %v434_v38 }
 0x580   :  { %v606_v39 = vpop.eup %605 }
 0x581   :  { %v487_v40 = vrot.slane %v606_v39, 2  ;;  %571 = vmatmul.msk.f32.vlgmr.msrb.gmra.mxu0 %vm68_vm2, %v606_v39 }
 0x583   :  { %v510_v41 = vsel %vm501_vm7, %v509_v35, %v487_v40 }
 0x5fe   :  { %v456_v43 = vpop.f32.mrf.mxu0 }
 0x5ff   :  { %v460_v44 = vadd.f32 %v459_v42, %v456_v43 }
 0x601   :  { %607 = vtanh.f32 %v460_v44 }
 0x607   :  { %v608_v45 = vpop.eup %607 }
 0x608   :  { %v490_v46 = vrot.slane %v608_v45, 1 }
 0x60a   :  { %v511_v47 = vsel %vm503_vm8, %v510_v41, %v490_v46 }
 0x60b   :  { %573 = vmatmul.msk.f32.gmra.mxu1 %vm68_vm2, %v511_v47 }
 0x688   :  { %v546_v48 = vpop.f32.mrf.mxu1 }
 0x689   :  { %v547_v49 = vadd.f32 %v576_v26, %v546_v48 }
 0x68b   :  { %550 = vst [vmem:[%s817_s6 + $0x8] sm:$0xff] %v547_v49 }

</bundles_post_ra>
